<compile_context>
chip_gen: v5e
topology: v5e:2x2
jax: 0.10.0
libtpu: 0.0.40
codegen_flags: <defaults>
</compile_context>

<pallas_src>
import jax
import jax.numpy as jnp
from jax.experimental import pallas as pl
from jax.experimental.pallas import tpu as pltpu


def _round_up(x, m):
    return ((x + m - 1) // m) * m


def _pad_to(a, shape):
    pads = [(0, t - s) for s, t in zip(a.shape, shape)]
    if any(p[1] for p in pads):
        a = jnp.pad(a, pads)
    return a


def _linear_kernel(x_ref, w_ref, b_ref, o_ref, acc_ref):
    # x_ref: (tm, tk)   w_ref: (tn, tk)  [PyTorch (out, in) layout, no transpose]
    # b_ref: (1, tn)    o_ref: (tm, tn)  acc_ref: (tm, tn) f32 scratch
    k = pl.program_id(2)

    @pl.when(k == 0)
    def _():
        acc_ref[...] = jnp.zeros_like(acc_ref)

    # y_tile += x_tile @ w_tile^T  (NT contraction, MXU-native; transpose is
    # expressed via dimension_numbers, never materialized).
    acc_ref[...] += jax.lax.dot_general(
        x_ref[...],
        w_ref[...],
        dimension_numbers=(((1,), (1,)), ((), ())),
        preferred_element_type=jnp.float32,
    )

    @pl.when(k == pl.num_programs(2) - 1)
    def _():
        # Bias added once, in f32, then cast to the output dtype.
        o_ref[...] = (acc_ref[...] + b_ref[...]).astype(o_ref.dtype)


def neural_net_forward(x, weight, bias, compute_dtype=None):
    """Forward pass of NeuralNet: Flatten(start_dim=1) -> Linear(n, n).

    x:      (B, C, H, W) with C*H*W == n
    weight: (n, n) in PyTorch Linear layout (out_features, in_features)
    bias:   (n,)
    compute_dtype: optional cast for x/weight at the call boundary (e.g.
        jnp.bfloat16 on v6e/v7x for 2x MXU throughput); accumulation stays f32.
    """
    B = x.shape[0]
    n_out, n_in = weight.shape
    x_flat = x.reshape(B, -1)                       # Flatten (start_dim=1)
    assert x_flat.shape[1] == n_in, "flattened feature dim must equal n"

    if compute_dtype is not None:
        x_flat = x_flat.astype(compute_dtype)
        weight = weight.astype(compute_dtype)

    # Tile sizes: lane-dense ((8,128)-aligned), MXU-sized, VMEM-friendly.
    tm = min(_round_up(B, 8), 256)
    tn = min(_round_up(n_out, 128), 256)
    tk = min(_round_up(n_in, 128), 512)

    # Pad operands so every dim is tile-divisible (zero padding on the K axis
    # contributes nothing to the accumulation; padded rows/cols sliced off).
    Bp = _round_up(B, tm)
    Np = _round_up(n_out, tn)
    Kp = _round_up(n_in, tk)

    x_p = _pad_to(x_flat, (Bp, Kp))
    w_p = _pad_to(weight, (Np, Kp))                 # original (out, in) layout
    b_p = _pad_to(bias.reshape(1, n_out).astype(jnp.float32), (1, Np))

    grid = (Bp // tm, Np // tn, Kp // tk)

    out_p = pl.pallas_call(
        _linear_kernel,
        out_shape=jax.ShapeDtypeStruct((Bp, Np), x.dtype),
        grid_spec=pltpu.PrefetchScalarGridSpec(
            num_scalar_prefetch=0,
            grid=grid,
            in_specs=[
                # x block (tm, tk) at (i, k)
                pl.BlockSpec((tm, tk), lambda i, j, k: (i, k)),
                # weight block (tn, tk) at (j, k): transpose absorbed in DMA
                pl.BlockSpec((tn, tk), lambda i, j, k: (j, k)),
                # bias block (1, tn) indexed only by the N axis
                pl.BlockSpec((1, tn), lambda i, j, k: (0, j)),
            ],
            out_specs=pl.BlockSpec((tm, tn), lambda i, j, k: (i, j)),
            scratch_shapes=[pltpu.VMEM((tm, tn), jnp.float32)],
        ),
        compiler_params=pltpu.CompilerParams(
            dimension_semantics=("parallel", "parallel", "arbitrary"),
        ),
    )(x_p, w_p, b_p)

    return out_p[:B, :n_out]


if __name__ == "__main__":
    key = jax.random.PRNGKey(0)
    k_x, k_w, k_b = jax.random.split(key, 3)

    # Small but non-degenerate shapes: x = (B, C, H, W), n = C*H*W = 1024,
    # so the tiled grid actually has multiple N/K steps (grid = (1, 4, 2)).
    B, C, H, W = 2, 4, 16, 16
    n = C * H * W

    x = jax.random.normal(k_x, (B, C, H, W), dtype=jnp.float32)

    # Deterministic PyTorch-style Linear init: U(-1/sqrt(n), 1/sqrt(n)).
    bound = 1.0 / jnp.sqrt(jnp.float32(n))
    weight = jax.random.uniform(k_w, (n, n), minval=-bound, maxval=bound,
                                dtype=jnp.float32)
    bias = jax.random.uniform(k_b, (n,), minval=-bound, maxval=bound,
                              dtype=jnp.float32)

    out = neural_net_forward(x, weight, bias)
    out = jax.block_until_ready(out)

    # Reference check against plain JAX (full-precision matmul).
    ref = jnp.dot(x.reshape(B, -1), weight.T,
                  precision=jax.lax.Precision.HIGHEST,
                  preferred_element_type=jnp.float32) + bias
    assert out.shape == (B, n)
    assert jnp.allclose(out, ref, atol=2e-3, rtol=2e-3), (
        float(jnp.max(jnp.abs(out - ref))))

    print("KERNEL_OK")
</pallas_src>

<mosaic_0001>
module attributes {stable_mosaic.version = 11 : i64} {
  func.func @_linear_kernel(%arg0: i32, %arg1: i32, %arg2: i32, %arg3: memref<8x512xf32, #tpu.memory_space<vmem>>, %arg4: memref<256x512xf32, #tpu.memory_space<vmem>>, %arg5: memref<1x256xf32, #tpu.memory_space<vmem>>, %arg6: memref<8x256xf32, #tpu.memory_space<vmem>>, %arg7: memref<8x256xf32, #tpu.memory_space<vmem>>) attributes {dimension_semantics = [#tpu.dimension_semantics<parallel>, #tpu.dimension_semantics<parallel>, #tpu.dimension_semantics<arbitrary>], iteration_bounds = array<i64: 1, 4, 2>, scalar_prefetch = 0 : i64, scratch_operands = 1 : i64, tpu.core_type = #tpu.core_type<tc>, window_params = [{transform_indices = @transform_0, window_bounds = array<i64: 8, 512>}, {transform_indices = @transform_1, window_bounds = array<i64: 256, 512>}, {transform_indices = @transform_2, window_bounds = array<i64: 1, 256>}, {transform_indices = @transform_3, window_bounds = array<i64: 8, 256>}]} {
    %c0_i32 = arith.constant 0 : i32
    %0 = arith.cmpi eq, %arg2, %c0_i32 : i32
    %1 = arith.extui %0 : i1 to i32
    %c0_i32_0 = arith.constant 0 : i32
    %2 = arith.cmpi ne, %1, %c0_i32_0 : i32
    scf.if %2 {
      %cst_9 = arith.constant 0.000000e+00 : f32
      %12 = vector.broadcast %cst_9 : f32 to vector<8x256xf32>
      %c0_10 = arith.constant 0 : index
      %c0_11 = arith.constant 0 : index
      %13 = vector.load %arg7[%c0_10, %c0_11] : memref<8x256xf32, #tpu.memory_space<vmem>>, vector<8x256xf32>
      tpu.vector_store %arg7[%c0_10, %c0_11], %12 {strides = array<i32>} : memref<8x256xf32, #tpu.memory_space<vmem>>, vector<8x256xf32>,
    } else {
    }
    %c0 = arith.constant 0 : index
    %c0_1 = arith.constant 0 : index
    %3 = vector.load %arg7[%c0, %c0_1] : memref<8x256xf32, #tpu.memory_space<vmem>>, vector<8x256xf32>
    %c0_2 = arith.constant 0 : index
    %c0_3 = arith.constant 0 : index
    %4 = vector.load %arg3[%c0_2, %c0_3] : memref<8x512xf32, #tpu.memory_space<vmem>>, vector<8x512xf32>
    %c0_4 = arith.constant 0 : index
    %c0_5 = arith.constant 0 : index
    %5 = vector.load %arg4[%c0_4, %c0_5] : memref<256x512xf32, #tpu.memory_space<vmem>>, vector<256x512xf32>
    %cst = arith.constant dense<0.000000e+00> : vector<8x256xf32>
    %6 = tpu.matmul %4, %5, %cst {dimension_numbers = #tpu.dot_dimension_numbers<[1], [1], [0], [0], [0, 0, 1, 0], [], []>} : vector<8x512xf32>, vector<256x512xf32>, vector<8x256xf32> -> vector<8x256xf32>
    %7 = arith.addf %3, %6 : vector<8x256xf32>
    %c0_6 = arith.constant 0 : index
    %c0_7 = arith.constant 0 : index
    %8 = vector.load %arg7[%c0_6, %c0_7] : memref<8x256xf32, #tpu.memory_space<vmem>>, vector<8x256xf32>
    tpu.vector_store %arg7[%c0_6, %c0_7], %7 {strides = array<i32>} : memref<8x256xf32, #tpu.memory_space<vmem>>, vector<8x256xf32>,
    %c1_i32 = arith.constant 1 : i32
    %9 = arith.cmpi eq, %arg2, %c1_i32 : i32
    %10 = arith.extui %9 : i1 to i32
    %c0_i32_8 = arith.constant 0 : i32
    %11 = arith.cmpi ne, %10, %c0_i32_8 : i32
    scf.if %11 {
      %c0_9 = arith.constant 0 : index
      %c0_10 = arith.constant 0 : index
      %12 = vector.load %arg7[%c0_9, %c0_10] : memref<8x256xf32, #tpu.memory_space<vmem>>, vector<8x256xf32>
      %c0_11 = arith.constant 0 : index
      %c0_12 = arith.constant 0 : index
      %13 = vector.load %arg5[%c0_11, %c0_12] : memref<1x256xf32, #tpu.memory_space<vmem>>, vector<1x256xf32>
      %14 = vector.broadcast %13 : vector<1x256xf32> to vector<8x256xf32>
      %15 = arith.addf %12, %14 : vector<8x256xf32>
      %c0_13 = arith.constant 0 : index
      %c0_14 = arith.constant 0 : index
      %16 = vector.load %arg6[%c0_13, %c0_14] : memref<8x256xf32, #tpu.memory_space<vmem>>, vector<8x256xf32>
      tpu.vector_store %arg6[%c0_13, %c0_14], %15 {strides = array<i32>} : memref<8x256xf32, #tpu.memory_space<vmem>>, vector<8x256xf32>,
    } else {
    }
    return
  }
  func.func @transform_0(%arg0: i32, %arg1: i32, %arg2: i32) -> (i32, i32) {
    %c0_i32 = arith.constant 0 : i32
    return %arg0, %arg2 : i32, i32
  }
  func.func @transform_1(%arg0: i32, %arg1: i32, %arg2: i32) -> (i32, i32) {
    %c0_i32 = arith.constant 0 : i32
    return %arg1, %arg2 : i32, i32
  }
  func.func @transform_2(%arg0: i32, %arg1: i32, %arg2: i32) -> (i32, i32) {
    %c0_i32 = arith.constant 0 : i32
    %c0_i32_0 = arith.constant 0 : i32
    return %c0_i32, %arg1 : i32, i32
  }
  func.func @transform_3(%arg0: i32, %arg1: i32, %arg2: i32) -> (i32, i32) {
    %c0_i32 = arith.constant 0 : i32
    return %arg0, %arg1 : i32, i32
  }
}

</mosaic_0001>

<bundles_post_ra>
// kernel: tpu_custom_call.1
= control target key start
LH: loop header
LB: loop body
LE: loop exit
PB: predicated region body
PF: predicated region fallthrough
CT: control target
= control target key end

     0   :  { %s1662_s0 = inlined_call_operand.hbm [shape: f32[8,1024], index: 0, kind: input, shape index: {}]   ;;  %s1663_s1 = inlined_call_operand.hbm [shape: f32[1024,1024], index: 1, kind: input, shape index: {}]   ;;  %s1664_s2 = inlined_call_operand.hbm [shape: f32[1,1024], index: 2, kind: input, shape index: {}]   ;;  %s1665_s3 = inlined_call_operand.hbm [shape: f32[8,1024], index: 3, kind: output, shape index: {}]  }
   0x1   :  { %1673 = sst [smem:[#allocation22_spill]] %s1662_s0 }
   0x2   :  { %1674 = sst [smem:[#allocation23_spill]] %s1663_s1 }
   0x3   :  { %1675 = sst [smem:[#allocation24_spill]] %s1665_s3 }
   0x4   :  { %8 = vsyncpa [#allocation4], 0 }
   0x5   :  { %10 = vsyncpa [#allocation4 + $0x1], 0 }
   0x6   :  { %11 = vsyncpa [#allocation7], 0 }
   0x7   :  { %13 = vsyncpa [#allocation7 + $0x1], 0 }
   0x8   :  { %14 = vsyncpa [#allocation5], 0 }
   0x9   :  { %16 = vsyncpa [#allocation5 + $0x1], 0  ;;  %s1216_s12 = smov 0   ;;  %s1218_s13 = smov 0  }
   0xa   :  { %s1220_s14 = smov 0   ;;  %s1222_s15 = smov 0  }
   0xb   :  { %s1224_s16 = smov 0   ;;  %s1226_s17 = smov 0  }
   0xc   :  { %s1228_s18 = smov 0   ;;  %s1230_s19 = smov 0  }
   0xd   :  { %s1232_s20 = smov 0   ;;  %s1234_s21 = smov 0  }
   0xe   :  { %s1236_s22 = smov 0   ;;  %s1238_s23 = smov 0  }
   0xf   :  { %s1240_s24 = smov 0   ;;  %s1242_s25 = smov 0  }
  0x10 LB: > { %1676 = sst [smem:[#allocation14_spill]] %s1158_s17  ;;  %p58_p0 = scmp.eq.s32.totalorder %s1190_s25, 0  ;;  %s1190_s25 = sphi %s1242_s25, %s22_s25   ;;  %s1186_s24 = sphi %s1240_s24, %s1704_s24   ;;  %s1182_s23 = sphi %s1238_s23, %s1703_s23   ;;  %s1178_s22 = sphi %s1236_s22, %s1702_s22   ;;  %s1174_s21 = sphi %s1234_s21, %s1701_s21   ;;  %s1170_s20 = sphi %s1232_s20, %s1700_s20   ;;  %s1166_s19 = sphi %s1230_s19, %s1712_s19   ;;  %s1162_s18 = sphi %s1228_s18, %s1711_s18   ;;  %s1158_s17 = sphi %s1226_s17, %s1698_s17   ;;  %s1154_s16 = sphi %s1224_s16, %s1710_s16   ;;  %s1150_s15 = sphi %s1222_s15, %s1709_s15   ;;  %s1146_s14 = sphi %s1220_s14, %s1708_s14   ;;  %s1142_s13 = sphi %s1218_s13, %s1707_s13   ;;  %s1138_s12 = sphi %s1216_s12, %s1706_s12  }
  0x11   : > { %1677 = sst [smem:[#allocation15_spill]] %s1170_s20  ;;  %p85_p1 = scmp.ne.s32.totalorder %s1158_s17, %s1154_s16 }
  0x12   : > { %1678 = sst [smem:[#allocation16_spill]] %s1182_s23  ;;  %p91_p2 = scmp.ne.s32.totalorder %s1154_s16, %s1150_s15 }
  0x13   : > { %1679 = sst [smem:[#allocation17_spill]] %s1186_s24  ;;  %p828_p3 = scmp.lt.s32.totalorder %s1190_s25, 8 }
  0x14   : > { %p87_p4 = por %p85_p1, %p58_p0  ;;  %s191_s27 = sand.u32 1, %s1190_s25  }
  0x15   : > { %s193_s28 = sand.u32 1, %s1158_s17   ;;  %s786_s30 = sshll.u32 %s1182_s23, 2 }
  0x16   : > { %s784_s29 = sshll.u32 %s193_s28, 10  ;;  %s804_s4 = sshll.u32 %s1186_s24, 8 }
  0x17   : > { %s201_s5 = sadd.s32 %s804_s4, %s786_s30  ;;  %s195_s6 = scalar_lea.vmem [#allocation6], %s784_s29 }
  0x18   : > { %s206_s7 = sshll.u32 %s195_s6, 4  ;;  %s788_s8 = sshll.u32 %s201_s5, 3  ;;  %s207_s7 = int_to_ptr.vmem [resolvable:$true] %s206_s7 }
  0x19   : > { %s1680_s1 = sld [smem:[#allocation23_spill]]  ;;  %p818_p5 = pnand %p828_p3, %p87_p4 }
  0x1a   : > { %s1304_s29 = scalar_lea.sflag [#allocation7], %s191_s27  ;;  %s1192_s30 = smov 1024  }
  0x1b   : > { %s1193_s4 = smov 512   ;;  %s1194_s5 = smov 32  }
  0x1c   : > { %p791_p6 = scmp.ge.s32.totalorder %s1190_s25, 1  ;;  %p233_p7 = scmp.lt.s32.totalorder %s1190_s25, 9 }
  0x1d   : > { %s34_s27 = sadd.s32 1, %s1182_s23  ;;  %s37_s9 = sadd.s32 1, %s1186_s24 }
  0x1e   : > { %p1309_p8 = pnand %p791_p6, %p233_p7  ;;  %p35_p9 = scmp.ge.s32.totalorder %s34_s27, 2 }
  0x1f   : > { %s203_s11 = scalar_lea.hbm %s1680_s1, %s788_s8  ;;  %s1314_s8 = sadd.s32 4294967295, %s1190_s25  }
  0x20   : > { %s204_s28 = sshll.u32 %s203_s11, 4  ;;  %s50_s10 = sadd.s32 1, %s1170_s20  ;;  %s205_s28 = int_to_ptr.hbm [resolvable:$true] %s204_s28 }
  0x21   : > { %820 = dma.hbm_to_vmem [thread:$0]  (!%p818_p5), %s205_s28, 16384, %s207_s7, %s1304_s29, %s1192_s30, %s1193_s4, %s1194_s5  }
  0x22   : > { %p57_p10 = scmp.ne.s32.totalorder %s1170_s20, %s1166_s19  ;;  %p63_p11 = scmp.ne.s32.totalorder %s1166_s19, %s1162_s18 }
  0x23   : > { %s1714_s27 = smov (%p35_p9, %s34_s27), 0  ;;  %s1716_s9 = smov (!%p35_p9, %s37_s9), %s1186_s24 }
  0x24   : > { %1682 = sst [smem:[#allocation18_spill]] %s1714_s27  ;;  %s46_s7 = ssub.s32 %s1182_s23, %s1714_s27 }
  0x25   : > { %p1330_p12 = por %p58_p0, %p57_p10  ;;  %p39_p13 = scmp.ge.s32.totalorder %s1716_s9, 4 }
  0x26   : > { %p48_p1 = scmp.eq.s32.totalorder %s46_s7, 0  ;;  %p64_p4 = scmp.eq.s32.totalorder %s1314_s8, 0 }
  0x27   : > { %s169_s28 = sand.u32 1, %s1170_s20   ;;  %s1718_s9 = smov (%p39_p13, %s1716_s9), 0 }
  0x28   : > { %1684 = sst [smem:[#allocation19_spill]] %s1718_s9  ;;  %p1343_p5 = por %p64_p4, %p63_p11 }
  0x29   : > { %s1339_s18 = scalar_select %p48_p1, %s1170_s20, %s50_s10  }
  0x2a   : > { %s73_s4 = ssub.s32 %s1186_s24, %s1718_s9  ;;  %p1354_p6 = por %p91_p2, %p64_p4 }
  0x2b   : > { %1685 = sst [smem:[#allocation20_spill]] %s1339_s18  ;;  %s75_s5 = sor.u32 %s73_s4, %s46_s7 }
  0x2c   : > { %p76_p7 = scmp.eq.s32.totalorder %s75_s5, 0  ;;  %s781_s10 = sshll.u32 %s169_s28, 5 }
  0x2d   : > { %s803_s1 = sshll.u32 %s1182_s23, 5  ;;  %s1688_s27 = sadd.s32 1, %s1158_s17 }
  0x2e   : > { %s1362_s18 = scalar_select %p76_p7, %s1158_s17, %s1688_s27  }
  0x2f   : > { %s1690_s0 = sld [smem:[#allocation22_spill]]  ;;  %s173_s3 = scalar_lea.vmem [#allocation3], %s781_s10 }
  0x30   : > { %1689 = sst [smem:[#allocation21_spill]] %s1362_s18  ;;  %s184_s5 = sshll.u32 %s173_s3, 4  ;;  %s185_s5 = int_to_ptr.vmem [resolvable:$true] %s184_s5 }
  0x31   : > { %p815_p2 = pnand %p828_p3, %p1330_p12  ;;  %s170_s23 = scalar_lea.sflag [#allocation4], %s169_s28 }
  0x32   : > { %s778_s27 = sadd.s32 4294967294, %s1190_s25   ;;  %p102_p9 = scmp.eq.s32.totalorder %s73_s4, 0 }
  0x33   : > { %s104_s20 = sadd.s32 1, %s1146_s14  ;;  %p111_p10 = scmp.ne.s32.totalorder %s1146_s14, %s1142_s13 }
  0x34   : > { %s1376_s9 = scalar_select %p102_p9, %s1146_s14, %s104_s20  }
  0x35   : > { %s180_s15 = scalar_lea.hbm %s1690_s0, %s803_s1  ;;  %p1380_p11 = por %p111_p10, %p58_p0 }
  0x36   : > { %s182_s7 = sshll.u32 %s180_s15, 4  ;;  %p117_p13 = scmp.ne.s32.totalorder %s1142_s13, %s1138_s12  ;;  %s183_s7 = int_to_ptr.hbm [resolvable:$true] %s182_s7 }
  0x37   : > { %817 = dma.hbm_to_vmem [thread:$0]  (!%p815_p2), %s183_s7, 512, %s185_s5, %s170_s23  }
  0x38   : > { %p143_p1 = scmp.eq.s32.totalorder %s1314_s8, 7  ;;  %p149_p12 = scmp.eq.s32.totalorder %s778_s27, 7 }
  0x39   : > { %p1389_p7 = por %p117_p13, %p64_p4  ;;  %s218_s23 = sand.u32 1, %s1146_s14  }
  0x3a   : > { %p1394_p2 = por %p143_p1, %p111_p10  ;;  %p1398_p0 = por %p149_p12, %p117_p13 }
  0x3b   : > { %s789_s4 = sshll.u32 %s218_s23, 1  ;;  %s790_s10 = sshll.u32 %s1186_s24, 1 }
  0x3c   : > { %s224_s5 = scalar_lea.hbm %s1664_s2, %s790_s10  ;;  %s220_s20 = scalar_lea.vmem [#allocation8], %s789_s4 }
  0x3d   : > { %s226_s27 = sshll.u32 %s224_s5, 4  ;;  %s228_s0 = sshll.u32 %s220_s20, 4  ;;  %s227_s27 = int_to_ptr.hbm [resolvable:$true] %s226_s27  ;;  %s229_s0 = int_to_ptr.vmem [resolvable:$true] %s228_s0 }
  0x3e   : > { %p821_p4 = pnand %p828_p3, %p1380_p11  ;;  %237 = sbr.rel (%p1309_p8) target bundleno = 383 (0x17f), region = 32 }
  0x3f   : > { %s239_s23 = sand.u32 (!%p1309_p8), 1, %s1166_s19  }
  0x40   : > { %823 = dma.hbm_to_vmem [thread:$0]  (!%p821_p4), %s227_s27, 32, %s229_s0, %s1304_s29  }
  0x41   : > { %s792_s24 = sshll.u32 (!%p1309_p8), %s239_s23, 5  ;;  %s240_s18 = scalar_lea.sflag (!%p1309_p8), [#allocation4], %s239_s23 }
  0x42   : > { %s1414_s17 = scalar_lea.vmem (!%p1309_p8), [#allocation3], %s792_s24 }
  0x43   : > { %1121 = dma.done.wait (%p1343_p5), %s240_s18, 512  }
  0x44   : > { %1123 = vsyncadd (%p1343_p5), %s240_s18, 4294966784  ;;  %s249_s1 = sand.u32 1, %s1314_s8   ;;  %s251_s0 = sand.u32 1, %s1154_s16  }
  0x45   : > { %s793_s29 = sshll.u32 %s251_s0, 10  ;;  %s250_s6 = scalar_lea.sflag [#allocation7], %s249_s1 }
  0x46   : > { %s1422_s4 = scalar_lea.vmem [#allocation6], %s793_s29 }
  0x47   : > { %1125 = dma.done.wait (%p1354_p6), %s250_s6, 16384  }
  0x48   : > { %1127 = vsyncadd (%p1354_p6), %s250_s6, 4294950912  ;;  %s1429_s24 = sand.u32 1, %s1142_s13  }
  0x49   : > { %s794_s18 = sshll.u32 %s1429_s24, 1 }
  0x4a   : > { %s1432_s30 = scalar_lea.vmem [#allocation8], %s794_s18 }
  0x4b   : > { %1129 = dma.done.wait (%p1389_p7), %s250_s6, 32  }
  0x4c   : > { %1131 = vsyncadd (%p1389_p7), %s250_s6, 4294967264  ;;  %s795_s8 = sshll.u32 %s1429_s24, 4  ;;  %p796_p3 = scmp.ne.s32.totalorder %s1174_s21, 0 }
  0x4d   : > { %s1439_s10 = scalar_lea.vmem [#allocation9], %s795_s8 }
  0x4e   : > { %305 = sbr.rel (%p796_p3) target bundleno = 86 (0x56), region = 48 }
  0x53   : > { %v1195_v0 = vmov 0.0  }
  0x54   : > { %306 = vst [vmem:[#allocation2] sm:$0xff] %v1195_v0 }
  0x55   : > { %307 = vst [vmem:[#allocation2 + $0x8] sm:$0xff] %v1195_v0 }
  0x56 PF: > { %v376_v1 = vld [vmem:[%s1422_s4 + $0x1f0] sm:$0xff]  ;;  %v377_v2 = vld [vmem:[%s1422_s4 + $0x1f8] sm:$0xff]  ;;  %v374_v3 = vld [vmem:[%s1422_s4 + $0x1e0] sm:$0xff]  ;;  %p797_p8 = scmp.ne.s32.totalorder %s1174_s21, 1 }
  0x57   : > { %482 = vmatpush.xpose.msra.mxu2 %v376_v1  ;;  %502 = vmatpush.xpose.msra.mxu3 %v377_v2  ;;  %v375_v4 = vld [vmem:[%s1422_s4 + $0x1e8] sm:$0xff]  ;;  %v372_v5 = vld [vmem:[%s1422_s4 + $0x1d0] sm:$0xff]  ;;  %v373_v6 = vld [vmem:[%s1422_s4 + $0x1d8] sm:$0xff] }
  0x58   : > { %442 = vmatpush.xpose.msra.mxu0 %v374_v3  ;;  %462 = vmatpush.xpose.msra.mxu1 %v375_v4  ;;  %v370_v7 = vld [vmem:[%s1422_s4 + $0x1c0] sm:$0xff]  ;;  %v371_v8 = vld [vmem:[%s1422_s4 + $0x1c8] sm:$0xff]  ;;  %v368_v9 = vld [vmem:[%s1422_s4 + $0x1b0] sm:$0xff] }
  0x59   : > { %v369_v10 = vld [vmem:[%s1422_s4 + $0x1b8] sm:$0xff]  ;;  %v366_v11 = vld [vmem:[%s1422_s4 + $0x1a0] sm:$0xff]  ;;  %v367_v12 = vld [vmem:[%s1422_s4 + $0x1a8] sm:$0xff] }
  0x5a   : > { %v364_v13 = vld [vmem:[%s1422_s4 + $0x190] sm:$0xff]  ;;  %v365_v14 = vld [vmem:[%s1422_s4 + $0x198] sm:$0xff]  ;;  %v362_v15 = vld [vmem:[%s1422_s4 + $0x180] sm:$0xff] }
  0x5b   : > { %483 = vmatpush.xpose.msra.mxu2 %v372_v5  ;;  %503 = vmatpush.xpose.msra.mxu3 %v373_v6  ;;  %v363_v16 = vld [vmem:[%s1422_s4 + $0x188] sm:$0xff]  ;;  %v360_v17 = vld [vmem:[%s1422_s4 + $0x170] sm:$0xff]  ;;  %v361_v18 = vld [vmem:[%s1422_s4 + $0x178] sm:$0xff] }
  0x5c   : > { %443 = vmatpush.xpose.msra.mxu0 %v370_v7  ;;  %463 = vmatpush.xpose.msra.mxu1 %v371_v8  ;;  %v358_v19 = vld [vmem:[%s1422_s4 + $0x160] sm:$0xff]  ;;  %v359_v20 = vld [vmem:[%s1422_s4 + $0x168] sm:$0xff]  ;;  %v356_v21 = vld [vmem:[%s1422_s4 + $0x150] sm:$0xff] }
  0x5d   : > { %v357_v22 = vld [vmem:[%s1422_s4 + $0x158] sm:$0xff]  ;;  %v354_v23 = vld [vmem:[%s1422_s4 + $0x140] sm:$0xff]  ;;  %v355_v24 = vld [vmem:[%s1422_s4 + $0x148] sm:$0xff] }
  0x5e   : > { %v352_v25 = vld [vmem:[%s1422_s4 + $0x130] sm:$0xff]  ;;  %v353_v26 = vld [vmem:[%s1422_s4 + $0x138] sm:$0xff]  ;;  %v350_v27 = vld [vmem:[%s1422_s4 + $0x120] sm:$0xff] }
  0x5f   : > { %484 = vmatpush.xpose.msra.mxu2 %v368_v9  ;;  %504 = vmatpush.xpose.msra.mxu3 %v369_v10  ;;  %v351_v28 = vld [vmem:[%s1422_s4 + $0x128] sm:$0xff]  ;;  %v348_v29 = vld [vmem:[%s1422_s4 + $0x110] sm:$0xff]  ;;  %v349_v30 = vld [vmem:[%s1422_s4 + $0x118] sm:$0xff] }
  0x60   : > { %444 = vmatpush.xpose.msra.mxu0 %v366_v11  ;;  %464 = vmatpush.xpose.msra.mxu1 %v367_v12  ;;  %v346_v31 = vld [vmem:[%s1422_s4 + $0x100] sm:$0xff]  ;;  %v347_v32 = vld [vmem:[%s1422_s4 + $0x108] sm:$0xff]  ;;  %v344_v33 = vld [vmem:[%s1422_s4 + $0xf0] sm:$0xff] }
  0x61   : > { %v345_v34 = vld [vmem:[%s1422_s4 + $0xf8] sm:$0xff]  ;;  %v342_v35 = vld [vmem:[%s1422_s4 + $0xe0] sm:$0xff]  ;;  %v343_v36 = vld [vmem:[%s1422_s4 + $0xe8] sm:$0xff] }
  0x62   : > { %v340_v37 = vld [vmem:[%s1422_s4 + $0xd0] sm:$0xff]  ;;  %v341_v38 = vld [vmem:[%s1422_s4 + $0xd8] sm:$0xff]  ;;  %v338_v39 = vld [vmem:[%s1422_s4 + $0xc0] sm:$0xff] }
  0x63   : > { %485 = vmatpush.xpose.msra.mxu2 %v364_v13  ;;  %505 = vmatpush.xpose.msra.mxu3 %v365_v14  ;;  %v339_v40 = vld [vmem:[%s1422_s4 + $0xc8] sm:$0xff]  ;;  %v336_v41 = vld [vmem:[%s1422_s4 + $0xb0] sm:$0xff]  ;;  %v337_v42 = vld [vmem:[%s1422_s4 + $0xb8] sm:$0xff] }
  0x64   : > { %445 = vmatpush.xpose.msra.mxu0 %v362_v15  ;;  %465 = vmatpush.xpose.msra.mxu1 %v363_v16  ;;  %v334_v43 = vld [vmem:[%s1422_s4 + $0xa0] sm:$0xff]  ;;  %v335_v44 = vld [vmem:[%s1422_s4 + $0xa8] sm:$0xff]  ;;  %v332_v45 = vld [vmem:[%s1422_s4 + $0x90] sm:$0xff] }
  0x65   : > { %v333_v46 = vld [vmem:[%s1422_s4 + $0x98] sm:$0xff]  ;;  %v330_v47 = vld [vmem:[%s1422_s4 + $0x80] sm:$0xff]  ;;  %v331_v48 = vld [vmem:[%s1422_s4 + $0x88] sm:$0xff] }
  0x66   : > { %v328_v49 = vld [vmem:[%s1422_s4 + $0x70] sm:$0xff]  ;;  %v329_v50 = vld [vmem:[%s1422_s4 + $0x78] sm:$0xff]  ;;  %v326_v51 = vld [vmem:[%s1422_s4 + $0x60] sm:$0xff] }
  0x67   : > { %486 = vmatpush.xpose.msra.mxu2 %v360_v17  ;;  %506 = vmatpush.xpose.msra.mxu3 %v361_v18  ;;  %v327_v52 = vld [vmem:[%s1422_s4 + $0x68] sm:$0xff]  ;;  %v324_v53 = vld [vmem:[%s1422_s4 + $0x50] sm:$0xff]  ;;  %v325_v54 = vld [vmem:[%s1422_s4 + $0x58] sm:$0xff] }
  0x68   : > { %446 = vmatpush.xpose.msra.mxu0 %v358_v19  ;;  %466 = vmatpush.xpose.msra.mxu1 %v359_v20  ;;  %v322_v55 = vld [vmem:[%s1422_s4 + $0x40] sm:$0xff]  ;;  %v323_v56 = vld [vmem:[%s1422_s4 + $0x48] sm:$0xff]  ;;  %v320_v57 = vld [vmem:[%s1422_s4 + $0x30] sm:$0xff] }
  0x69   : > { %v321_v58 = vld [vmem:[%s1422_s4 + $0x38] sm:$0xff]  ;;  %v318_v59 = vld [vmem:[%s1422_s4 + $0x20] sm:$0xff]  ;;  %v319_v60 = vld [vmem:[%s1422_s4 + $0x28] sm:$0xff] }
  0x6a   : > { %v316_v61 = vld [vmem:[%s1422_s4 + $0x10] sm:$0xff]  ;;  %v317_v62 = vld [vmem:[%s1422_s4 + $0x18] sm:$0xff]  ;;  %v314_v1 = vld [vmem:[%s1422_s4] sm:$0xff] }
  0x6b   : > { %487 = vmatpush.xpose.msra.mxu2 %v356_v21  ;;  %507 = vmatpush.xpose.msra.mxu3 %v357_v22  ;;  %v440_v63 = vld [vmem:[%s1422_s4 + $0x3f0] sm:$0xff]  ;;  %v441_v0 = vld [vmem:[%s1422_s4 + $0x3f8] sm:$0xff]  ;;  %v315_v2 = vld [vmem:[%s1422_s4 + $0x8] sm:$0xff] }
  0x6c   : > { %447 = vmatpush.xpose.msra.mxu0 %v354_v23  ;;  %467 = vmatpush.xpose.msra.mxu1 %v355_v24  ;;  %v438_v3 = vld [vmem:[%s1422_s4 + $0x3e0] sm:$0xff]  ;;  %v439_v4 = vld [vmem:[%s1422_s4 + $0x3e8] sm:$0xff]  ;;  %v436_v5 = vld [vmem:[%s1422_s4 + $0x3d0] sm:$0xff] }
  0x6d   : > { %v437_v6 = vld [vmem:[%s1422_s4 + $0x3d8] sm:$0xff]  ;;  %v434_v7 = vld [vmem:[%s1422_s4 + $0x3c0] sm:$0xff]  ;;  %v435_v8 = vld [vmem:[%s1422_s4 + $0x3c8] sm:$0xff] }
  0x6e   : > { %v432_v9 = vld [vmem:[%s1422_s4 + $0x3b0] sm:$0xff]  ;;  %v433_v10 = vld [vmem:[%s1422_s4 + $0x3b8] sm:$0xff]  ;;  %v430_v11 = vld [vmem:[%s1422_s4 + $0x3a0] sm:$0xff] }
  0x6f   : > { %488 = vmatpush.xpose.msra.mxu2 %v352_v25  ;;  %508 = vmatpush.xpose.msra.mxu3 %v353_v26  ;;  %v431_v12 = vld [vmem:[%s1422_s4 + $0x3a8] sm:$0xff]  ;;  %v428_v13 = vld [vmem:[%s1422_s4 + $0x390] sm:$0xff]  ;;  %v429_v14 = vld [vmem:[%s1422_s4 + $0x398] sm:$0xff] }
  0x70   : > { %448 = vmatpush.xpose.msra.mxu0 %v350_v27  ;;  %468 = vmatpush.xpose.msra.mxu1 %v351_v28  ;;  %v426_v15 = vld [vmem:[%s1422_s4 + $0x380] sm:$0xff]  ;;  %v427_v16 = vld [vmem:[%s1422_s4 + $0x388] sm:$0xff]  ;;  %v424_v17 = vld [vmem:[%s1422_s4 + $0x370] sm:$0xff] }
  0x71   : > { %v425_v18 = vld [vmem:[%s1422_s4 + $0x378] sm:$0xff]  ;;  %v422_v19 = vld [vmem:[%s1422_s4 + $0x360] sm:$0xff]  ;;  %v423_v20 = vld [vmem:[%s1422_s4 + $0x368] sm:$0xff] }
  0x72   : > { %v420_v21 = vld [vmem:[%s1422_s4 + $0x350] sm:$0xff]  ;;  %v421_v22 = vld [vmem:[%s1422_s4 + $0x358] sm:$0xff]  ;;  %v418_v23 = vld [vmem:[%s1422_s4 + $0x340] sm:$0xff] }
  0x73   : > { %489 = vmatpush.xpose.msra.mxu2 %v348_v29  ;;  %509 = vmatpush.xpose.msra.mxu3 %v349_v30  ;;  %v419_v24 = vld [vmem:[%s1422_s4 + $0x348] sm:$0xff]  ;;  %v1531_v25 = vld [vmem:[%s1414_s17 + $0x10] sm:$0xff]  ;;  %v417_v27 = vld [vmem:[%s1422_s4 + $0x338] sm:$0xff] }
  0x74   : > { %449 = vmatpush.xpose.msra.mxu0 %v346_v31  ;;  %469 = vmatpush.xpose.msra.mxu1 %v347_v32  ;;  %v416_v26 = vld [vmem:[%s1422_s4 + $0x330] sm:$0xff]  ;;  %v414_v28 = vld [vmem:[%s1422_s4 + $0x320] sm:$0xff]  ;;  %v415_v29 = vld [vmem:[%s1422_s4 + $0x328] sm:$0xff] }
  0x75   : > { %v1539_v30 = vld [vmem:[%s1414_s17 + $0x18] sm:$0xff]  ;;  %v1542_v31 = vld [vmem:[%s1414_s17] sm:$0xff]  ;;  %v412_v32 = vld [vmem:[%s1422_s4 + $0x310] sm:$0xff] }
  0x77   : > { %490 = vmatpush.xpose.msra.mxu2 %v344_v33  ;;  %510 = vmatpush.xpose.msra.mxu3 %v345_v34  ;;  %v413_v33 = vld [vmem:[%s1422_s4 + $0x318] sm:$0xff]  ;;  %v1549_v34 = vld [vmem:[%s1414_s17 + $0x8] sm:$0xff] }
  0x78   : > { %450 = vmatpush.xpose.msra.mxu0 %v342_v35  ;;  %470 = vmatpush.xpose.msra.mxu1 %v343_v36  ;;  %v410_v35 = vld [vmem:[%s1422_s4 + $0x300] sm:$0xff]  ;;  %v411_v36 = vld [vmem:[%s1422_s4 + $0x308] sm:$0xff] }
  0x7b   : > { %491 = vmatpush.xpose.msra.mxu2 %v340_v37  ;;  %511 = vmatpush.xpose.msra.mxu3 %v341_v38  ;;  %v408_v37 = vld [vmem:[%s1422_s4 + $0x2f0] sm:$0xff]  ;;  %v409_v38 = vld [vmem:[%s1422_s4 + $0x2f8] sm:$0xff] }
  0x7c   : > { %451 = vmatpush.xpose.msra.mxu0 %v338_v39  ;;  %471 = vmatpush.xpose.msra.mxu1 %v339_v40  ;;  %v406_v39 = vld [vmem:[%s1422_s4 + $0x2e0] sm:$0xff]  ;;  %v407_v40 = vld [vmem:[%s1422_s4 + $0x2e8] sm:$0xff] }
  0x7f   : > { %492 = vmatpush.xpose.msra.mxu2 %v336_v41  ;;  %512 = vmatpush.xpose.msra.mxu3 %v337_v42  ;;  %v404_v41 = vld [vmem:[%s1422_s4 + $0x2d0] sm:$0xff]  ;;  %v405_v42 = vld [vmem:[%s1422_s4 + $0x2d8] sm:$0xff] }
  0x80   : > { %452 = vmatpush.xpose.msra.mxu0 %v334_v43  ;;  %472 = vmatpush.xpose.msra.mxu1 %v335_v44  ;;  %v402_v43 = vld [vmem:[%s1422_s4 + $0x2c0] sm:$0xff]  ;;  %v403_v44 = vld [vmem:[%s1422_s4 + $0x2c8] sm:$0xff] }
  0x83   : > { %493 = vmatpush.xpose.msra.mxu2 %v332_v45  ;;  %513 = vmatpush.xpose.msra.mxu3 %v333_v46  ;;  %v400_v45 = vld [vmem:[%s1422_s4 + $0x2b0] sm:$0xff]  ;;  %v401_v46 = vld [vmem:[%s1422_s4 + $0x2b8] sm:$0xff] }
  0x84   : > { %453 = vmatpush.xpose.msra.mxu0 %v330_v47  ;;  %473 = vmatpush.xpose.msra.mxu1 %v331_v48  ;;  %v398_v47 = vld [vmem:[%s1422_s4 + $0x2a0] sm:$0xff]  ;;  %v399_v48 = vld [vmem:[%s1422_s4 + $0x2a8] sm:$0xff] }
  0x87   : > { %494 = vmatpush.xpose.msra.mxu2 %v328_v49  ;;  %514 = vmatpush.xpose.msra.mxu3 %v329_v50  ;;  %v396_v49 = vld [vmem:[%s1422_s4 + $0x290] sm:$0xff]  ;;  %v397_v50 = vld [vmem:[%s1422_s4 + $0x298] sm:$0xff] }
  0x88   : > { %454 = vmatpush.xpose.msra.mxu0 %v326_v51  ;;  %474 = vmatpush.xpose.msra.mxu1 %v327_v52  ;;  %v394_v51 = vld [vmem:[%s1422_s4 + $0x280] sm:$0xff]  ;;  %v395_v52 = vld [vmem:[%s1422_s4 + $0x288] sm:$0xff] }
  0x8b   : > { %495 = vmatpush.xpose.msra.mxu2 %v324_v53  ;;  %515 = vmatpush.xpose.msra.mxu3 %v325_v54  ;;  %v392_v53 = vld [vmem:[%s1422_s4 + $0x270] sm:$0xff]  ;;  %v393_v54 = vld [vmem:[%s1422_s4 + $0x278] sm:$0xff] }
  0x8c   : > { %455 = vmatpush.xpose.msra.mxu0 %v322_v55  ;;  %475 = vmatpush.xpose.msra.mxu1 %v323_v56  ;;  %v390_v55 = vld [vmem:[%s1422_s4 + $0x260] sm:$0xff]  ;;  %v391_v56 = vld [vmem:[%s1422_s4 + $0x268] sm:$0xff] }
  0x8f   : > { %496 = vmatpush.xpose.msra.mxu2 %v320_v57  ;;  %516 = vmatpush.xpose.msra.mxu3 %v321_v58  ;;  %v388_v57 = vld [vmem:[%s1422_s4 + $0x250] sm:$0xff]  ;;  %v389_v58 = vld [vmem:[%s1422_s4 + $0x258] sm:$0xff] }
  0x90   : > { %456 = vmatpush.xpose.msra.mxu0 %v318_v59  ;;  %476 = vmatpush.xpose.msra.mxu1 %v319_v60  ;;  %v386_v59 = vld [vmem:[%s1422_s4 + $0x240] sm:$0xff]  ;;  %v387_v60 = vld [vmem:[%s1422_s4 + $0x248] sm:$0xff] }
  0x93   : > { %497 = vmatpush.xpose.msra.mxu2 %v316_v61  ;;  %517 = vmatpush.xpose.msra.mxu3 %v317_v62  ;;  %v384_v61 = vld [vmem:[%s1422_s4 + $0x230] sm:$0xff]  ;;  %v385_v62 = vld [vmem:[%s1422_s4 + $0x238] sm:$0xff] }
  0x94   : > { %457 = vmatpush.xpose.msra.mxu0 %v314_v1  ;;  %477 = vmatpush.xpose.msra.mxu1 %v315_v2  ;;  %v380_v1 = vld [vmem:[%s1422_s4 + $0x210] sm:$0xff]  ;;  %v381_v2 = vld [vmem:[%s1422_s4 + $0x218] sm:$0xff] }
  0x96   : > { %498 = vmatmul.f32.vlgmr.msra.gmra.mxu2 %v1531_v25  ;;  %518 = vmatmul.f32.vlgmr.msra.gmra.mxu3 %v1539_v30 }
  0x97   : > { %562 = vmatpush.xpose.msrb.mxu2 %v440_v63  ;;  %582 = vmatpush.xpose.msrb.mxu3 %v441_v0  ;;  %v382_v63 = vld [vmem:[%s1422_s4 + $0x220] sm:$0xff]  ;;  %v383_v0 = vld [vmem:[%s1422_s4 + $0x228] sm:$0xff] }
  0x98   : > { %522 = vmatpush.xpose.msrb.mxu0 %v438_v3  ;;  %542 = vmatpush.xpose.msrb.mxu1 %v439_v4  ;;  %v378_v3 = vld [vmem:[%s1422_s4 + $0x200] sm:$0xff]  ;;  %v379_v4 = vld [vmem:[%s1422_s4 + $0x208] sm:$0xff] }
  0x99   : > { %458 = vmatmul.f32.vlgmr.msra.gmra.mxu0 %v1542_v31  ;;  %478 = vmatmul.f32.vlgmr.msra.gmra.mxu1 %v1549_v34 }
  0x9b   : > { %563 = vmatpush.xpose.msrb.mxu2 %v436_v5  ;;  %583 = vmatpush.xpose.msrb.mxu3 %v437_v6 }
  0x9c   : > { %523 = vmatpush.xpose.msrb.mxu0 %v434_v7  ;;  %543 = vmatpush.xpose.msrb.mxu1 %v435_v8 }
  0x9f   : > { %564 = vmatpush.xpose.msrb.mxu2 %v432_v9  ;;  %584 = vmatpush.xpose.msrb.mxu3 %v433_v10  ;;  %v308_v10 = vld [vmem:[#allocation2] sm:$0xff] }
  0xa0   : > { %524 = vmatpush.xpose.msrb.mxu0 %v430_v11  ;;  %544 = vmatpush.xpose.msrb.mxu1 %v431_v12 }
  0xa3   : > { %565 = vmatpush.xpose.msrb.mxu2 %v428_v13  ;;  %585 = vmatpush.xpose.msrb.mxu3 %v429_v14 }
  0xa4   : > { %525 = vmatpush.xpose.msrb.mxu0 %v426_v15  ;;  %545 = vmatpush.xpose.msrb.mxu1 %v427_v16 }
  0xa7   : > { %566 = vmatpush.xpose.msrb.mxu2 %v424_v17  ;;  %586 = vmatpush.xpose.msrb.mxu3 %v425_v18 }
  0xa8   : > { %526 = vmatpush.xpose.msrb.mxu0 %v422_v19  ;;  %546 = vmatpush.xpose.msrb.mxu1 %v423_v20  ;;  %v309_v20 = vld [vmem:[#allocation2 + $0x8] sm:$0xff] }
  0xab   : > { %567 = vmatpush.xpose.msrb.mxu2 %v420_v21  ;;  %587 = vmatpush.xpose.msrb.mxu3 %v421_v22 }
  0xac   : > { %527 = vmatpush.xpose.msrb.mxu0 %v418_v23  ;;  %547 = vmatpush.xpose.msrb.mxu1 %v419_v24 }
  0xaf   : > { %568 = vmatpush.xpose.msrb.mxu2 %v416_v26  ;;  %588 = vmatpush.xpose.msrb.mxu3 %v417_v27 }
  0xb0   : > { %528 = vmatpush.xpose.msrb.mxu0 %v414_v28  ;;  %548 = vmatpush.xpose.msrb.mxu1 %v415_v29 }
  0xb3   : > { %569 = vmatpush.xpose.msrb.mxu2 %v412_v32  ;;  %589 = vmatpush.xpose.msrb.mxu3 %v413_v33 }
  0xb4   : > { %529 = vmatpush.xpose.msrb.mxu0 %v410_v35  ;;  %549 = vmatpush.xpose.msrb.mxu1 %v411_v36 }
  0xb7   : > { %570 = vmatpush.xpose.msrb.mxu2 %v408_v37  ;;  %590 = vmatpush.xpose.msrb.mxu3 %v409_v38 }
  0xb8   : > { %530 = vmatpush.xpose.msrb.mxu0 %v406_v39  ;;  %550 = vmatpush.xpose.msrb.mxu1 %v407_v40 }
  0xbb   : > { %571 = vmatpush.xpose.msrb.mxu2 %v404_v41  ;;  %591 = vmatpush.xpose.msrb.mxu3 %v405_v42 }
  0xbc   : > { %531 = vmatpush.xpose.msrb.mxu0 %v402_v43  ;;  %551 = vmatpush.xpose.msrb.mxu1 %v403_v44 }
  0xbf   : > { %572 = vmatpush.xpose.msrb.mxu2 %v400_v45  ;;  %592 = vmatpush.xpose.msrb.mxu3 %v401_v46 }
  0xc0   : > { %532 = vmatpush.xpose.msrb.mxu0 %v398_v47  ;;  %552 = vmatpush.xpose.msrb.mxu1 %v399_v48 }
  0xc3   : > { %573 = vmatpush.xpose.msrb.mxu2 %v396_v49  ;;  %593 = vmatpush.xpose.msrb.mxu3 %v397_v50 }
  0xc4   : > { %533 = vmatpush.xpose.msrb.mxu0 %v394_v51  ;;  %553 = vmatpush.xpose.msrb.mxu1 %v395_v52 }
  0xc7   : > { %574 = vmatpush.xpose.msrb.mxu2 %v392_v53  ;;  %594 = vmatpush.xpose.msrb.mxu3 %v393_v54 }
  0xc8   : > { %534 = vmatpush.xpose.msrb.mxu0 %v390_v55  ;;  %554 = vmatpush.xpose.msrb.mxu1 %v391_v56 }
  0xcb   : > { %575 = vmatpush.xpose.msrb.mxu2 %v388_v57  ;;  %595 = vmatpush.xpose.msrb.mxu3 %v389_v58 }
  0xcc   : > { %535 = vmatpush.xpose.msrb.mxu0 %v386_v59  ;;  %555 = vmatpush.xpose.msrb.mxu1 %v387_v60 }
  0xcf   : > { %576 = vmatpush.xpose.msrb.mxu2 %v384_v61  ;;  %596 = vmatpush.xpose.msrb.mxu3 %v385_v62 }
  0xd0   : > { %536 = vmatpush.xpose.msrb.mxu0 %v382_v63  ;;  %556 = vmatpush.xpose.msrb.mxu1 %v383_v0 }
  0xd3   : > { %577 = vmatpush.xpose.msrb.mxu2 %v380_v1  ;;  %597 = vmatpush.xpose.msrb.mxu3 %v381_v2 }
  0xd4   : > { %537 = vmatpush.xpose.msrb.mxu0 %v378_v3  ;;  %557 = vmatpush.xpose.msrb.mxu1 %v379_v4 }
  0xd6   : > { %578 = vmatmul.f32.vlgmr.msrb.gmra.mxu2 %v1531_v25  ;;  %598 = vmatmul.f32.vlgmr.msrb.gmra.mxu3 %v1539_v30 }
  0xd7   : > { %538 = vmatmul.f32.vlgmr.msrb.gmra.mxu0 %v1542_v31  ;;  %558 = vmatmul.f32.vlgmr.msrb.gmra.mxu1 %v1549_v34 }
 0x116   : > { %v459_v5 = vpop.f32.mrf.mxu0  ;;  %v479_v6 = vpop.f32.mrf.mxu1 }
 0x117   : > { %v480_v8 = vadd.f32 %v479_v6, %v459_v5 }
 0x119   : > { %v499_v7 = vpop.f32.mrf.mxu2  ;;  %v519_v11 = vpop.f32.mrf.mxu3 }
 0x11a   : > { %v500_v9 = vadd.f32 %v499_v7, %v480_v8 }
 0x11c   : > { %v520_v12 = vadd.f32 %v519_v11, %v500_v9 }
 0x11e   : > { %v602_v13 = vadd.f32 %v520_v12, %v308_v10 }
 0x120   : > { %604 = vst [vmem:[#allocation2] sm:$0xff] %v602_v13 }
 0x154   : > { %v539_v14 = vpop.f32.mrf.mxu0  ;;  %v559_v15 = vpop.f32.mrf.mxu1 }
 0x155   : > { %v560_v16 = vadd.f32 %v559_v15, %v539_v14 }
 0x159   : > { %v579_v17 = vpop.f32.mrf.mxu2  ;;  %v599_v18 = vpop.f32.mrf.mxu3 }
 0x15a   : > { %v580_v19 = vadd.f32 %v579_v17, %v560_v16 }
 0x15c   : > { %v600_v21 = vadd.f32 %v599_v18, %v580_v19  ;;  %609 = sbr.rel (%p797_p8) target bundleno = 363 (0x16b), region = 52 }
 0x15e   : > { %v603_v22 = vadd.f32 %v600_v21, %v309_v20 }
 0x160   : > { %605 = vst [vmem:[#allocation2 + $0x8] sm:$0xff] %v603_v22 }
 0x161   : > { %v610_v23 = vld [vmem:[#allocation2] sm:$0xff]  ;;  %v612_v24 = vld [vmem:[%s1432_s30] sm:$0x3] }
 0x162   : > { %v614_v26 = vperm.slane %v612_v24, 0  ;;  %v615_v27 = vperm.slane %v612_v24, 1 }
 0x164   : > { %v618_v28 = vadd.f32 %v614_v26, %v610_v23 }
 0x166   : > { %620 = vst [vmem:[%s1439_s10] sm:$0xff] %v618_v28 }
 0x167   : > { %v611_v25 = vld [vmem:[#allocation2 + $0x8] sm:$0xff] }
 0x168   : > { %v619_v29 = vadd.f32 %v615_v27, %v611_v25 }
 0x16a   : > { %621 = vst [vmem:[%s1439_s10 + $0x8] sm:$0xff] %v619_v29 }
 0x16b PF: > { %s805_s17 = sshll.u32 %s1178_s22, 4  ;;  %s1695_s3 = sld [smem:[#allocation24_spill]] }
 0x16c   : > { %s638_s7 = sshll.u32 %s1439_s10, 4  ;;  %s623_s27 = scalar_lea.sflag [#allocation5], %s1429_s24  ;;  %s639_s7 = int_to_ptr.vmem [resolvable:$true] %s638_s7 }
 0x171   : > { %s636_s15 = scalar_lea.hbm %s1695_s3, %s805_s17  ;;  %s1056_s22 = scalar_lea.hbm %s1695_s3, 64 }
 0x172   : > { %s640_s5 = sshll.u32 %s636_s15, 4  ;;  %s641_s5 = int_to_ptr.hbm [resolvable:$true] %s640_s5 }
 0x173   : > { %s1050_s20 = sshra.s32 %s641_s5, 4  ;;  %s1051_s20 = int_to_ptr.hbm [resolvable:$true] %s1050_s20 }
 0x174   : > { %s1052_s23 = scalar_lea.hbm %s1051_s20, 16  ;;  %p1057_p10 = scmp.lt.s32.totalorder %s1051_s20, %s1695_s3 }
 0x175   : > { %p1053_p5 = scmp.ne.s32.totalorder %s1051_s20, %s1052_s23  ;;  %p1058_p11 = scmp.lt.s32.totalorder %s1056_s22, %s1052_s23 }
 0x177   : > { %p1054_p6 = pnand %p1053_p5, %p1394_p2  ;;  %p1059_p13 = por %p1058_p11, %p1057_p10 }
 0x179   : > { %p1055_p9 = pneg %p1054_p6 }
 0x17b   : > { %p1060_p1 = pnand %p1059_p13, %p1055_p9 }
 0x17d   : > { %1063 = shalt.err (!%p1060_p1)
}
 0x17e   : > { %812 = dma.vmem_to_hbm [thread:$0]  (%p1394_p2), %s639_s7, 256, %s641_s5, %s623_s27  }
 0x17f PF: > { %p829_p12 = scmp.ge.s32.totalorder %s1190_s25, 2  ;;  %s652_s4 = sand.u32 1, %s1138_s12  }
 0x180   : > { %s653_s24 = scalar_lea.sflag [#allocation5], %s652_s4 }
 0x181   : > { %p825_p7 = pnand %p829_p12, %p1398_p0 }
 0x183   : > { %p826_p4 = pneg %p825_p7 }
 0x185   : > { %1133 = dma.done.wait (%p826_p4), %s653_s24, 256  }
 0x186   : > { %1135 = vsyncadd (%p826_p4), %s653_s24, 4294967040  ;;  %s22_s25 = sadd.s32 1, %s1190_s25   ;;  %s1697_s11 = sld [smem:[#allocation14_spill]] }
 0x187   : > { %p1615_p3 = scmp.ge.s32.totalorder %s22_s25, 10   ;;  %s1698_s17 = sld [smem:[#allocation21_spill]] }
 0x188   : > { %s1699_s30 = sld [smem:[#allocation15_spill]]  ;;  %s1706_s12 = smov %s1142_s13 }
 0x189   : > { %s1700_s20 = sld [smem:[#allocation20_spill]]  ;;  %s1707_s13 = smov %s1146_s14 }
 0x18a   : > { %s1701_s21 = sld [smem:[#allocation16_spill]]  ;;  %s1708_s14 = smov %s1376_s9 }
 0x18b   : > { %s1702_s22 = sld [smem:[#allocation17_spill]]  ;;  %s1709_s15 = smov %s1154_s16 }
 0x18c   : > { %s1703_s23 = sld [smem:[#allocation18_spill]]  ;;  %s1710_s16 = smov %s1697_s11 }
 0x18d   : > { %s1704_s24 = sld [smem:[#allocation19_spill]]  ;;  %s1711_s18 = smov %s1166_s19 }
 0x18e   : > { %s1712_s19 = smov %s1699_s30  ;;  %21 = sbr.rel (!%p1615_p3) target bundleno = 16 (0x10), region = 109 }
 0x193   :  { %659 = vsyncpa [#allocation4], 1 }
 0x194   :  { %661 = vsyncpa [#allocation4 + $0x1], 1 }
 0x195   :  { %662 = vsyncpa [#allocation7], 1 }
 0x196   :  { %664 = vsyncpa [#allocation7 + $0x1], 1 }
 0x197   :  { %665 = vsyncpa [#allocation5], 1 }
 0x198   :  { %667 = vsyncpa [#allocation5 + $0x1], 1 }

</bundles_post_ra>
